<compile_context>
chip_gen: v7x
topology: tpu7x:2x2x1
jax: 0.10.0
libtpu: 0.0.40
codegen_flags: <defaults>
</compile_context>

<pallas_src>
import functools

import jax
import jax.numpy as jnp
from jax import lax
from jax.experimental import pallas as pl
from jax.experimental.pallas import tpu as pltpu


_VMEM_LIMIT_BYTES = 48 * 1024 * 1024  # < v7x 64 MiB physical; safe on v5e/v6e.


def _round_up(x, m):
    return (x + m - 1) // m * m


def _pick_vocab_tile(V, cap=1024):
    """Multiple of 128, <= cap; divides V exactly whenever V % 128 == 0."""
    cap = max(128, (cap // 128) * 128)
    if V % 128 == 0:
        for t in range(min(cap, V), 0, -128):
            if V % t == 0:
                return t
    return min(cap, _round_up(V, 128))


# -----------------------------------------------------------------------------
# Param prep (done once, outside the per-call path).
# -----------------------------------------------------------------------------
def prepare_params(params, *, tile_v_cap=1024):
    embed, w, b = params["embed"], params["w_vocab"], params["b_vocab"]
    D = embed.shape[-1]
    V = w.shape[-1]
    Dp = _round_up(D, 128)
    tile_v = _pick_vocab_tile(V, tile_v_cap)
    Vp = _round_up(V, tile_v)
    scale = 1.0 / float(D) ** 0.5
    # Fold the attention scale + D-pad + bf16 cast into the embedding table.
    embed_p = jnp.pad((embed * scale).astype(jnp.bfloat16), ((0, 0), (0, Dp - D)))
    w_p = jnp.pad(w, ((0, Dp - D), (0, Vp - V))).astype(jnp.bfloat16)
    # Padded vocab columns get a -1e30 bias so they vanish from the LSE.
    b_p = jnp.pad(b.reshape(1, V).astype(jnp.float32), ((0, 0), (0, Vp - V)),
                  constant_values=-1e30)
    return {"embed": embed_p, "w": w_p, "b": b_p,
            "D": D, "Dp": Dp, "V": V, "Vp": Vp, "tile_v": tile_v}


# -----------------------------------------------------------------------------
# Stage 1: masked cross-attention.  grid = (B, S_tiles), both "parallel".
# -----------------------------------------------------------------------------
def attn_kernel(q_ref, kv_ref, kbias_ref, ctx_ref):
    q = q_ref[0]                       # (ts, Dp) bf16, pre-scaled by 1/sqrt(D)
    kv = kv_ref[0]                     # (T, Dp)  bf16 (k == v == encoder_outputs)
    # scores = q @ kv^T : contract D on both operands (no k.T materialized).
    scores = lax.dot_general(q, kv, (((1,), (1,)), ((), ())),
                             preferred_element_type=jnp.float32)   # (ts, T) f32
    scores = scores + kbias_ref[0]     # additive mask: 0 (keep) / -1e30 (drop)
    m = jnp.max(scores, axis=-1, keepdims=True)
    p = jnp.exp(scores - m)
    denom = jnp.sum(p, axis=-1, keepdims=True)
    ctx = lax.dot_general(p.astype(jnp.bfloat16), kv, (((1,), (0,)), ((), ())),
                          preferred_element_type=jnp.float32)      # (ts, Dp) f32
    # Normalize the (ts, Dp) context (not the (ts, T) probs); approx reciprocal
    # runs on the otherwise-idle EUP slot.
    ctx_ref[0] = (ctx * pl.reciprocal(denom, approx=True)).astype(jnp.bfloat16)


def cross_attention(prep, input_ids, enc, key_mask, *, s_tile_cap=256):
    B, S = input_ids.shape
    _, T, D = enc.shape
    Dp = prep["Dp"]
    Sp = _round_up(S, 8)
    ts = min(s_tile_cap, Sp)
    Sp2 = _round_up(Sp, ts)

    # Gather directly from the pre-padded / pre-scaled bf16 table (no per-call
    # pad+cast of the query activations).
    ids = jnp.pad(input_ids.astype(jnp.int32), ((0, 0), (0, Sp2 - S)))
    q = jnp.take(prep["embed"], ids, axis=0)                     # (B, Sp2, Dp) bf16
    enc_p = jnp.pad(enc, ((0, 0), (0, 0), (0, Dp - D))).astype(jnp.bfloat16)
    kbias = ((key_mask.astype(jnp.float32) - 1.0) * 1e30).reshape(B, 1, T)

    # TODO(synk): for very long T, tile the attention over T (flash-style) so
    # the (ts, T) f32 scores intermediate never materializes whole on v7x.
    ctx = pl.pallas_call(
        attn_kernel,
        out_shape=jax.ShapeDtypeStruct((B, Sp2, Dp), jnp.bfloat16),
        grid_spec=pltpu.PrefetchScalarGridSpec(
            num_scalar_prefetch=0,
            grid=(B, Sp2 // ts),
            in_specs=[
                pl.BlockSpec((1, ts, Dp), lambda b, s: (b, s, 0)),   # q
                pl.BlockSpec((1, T, Dp), lambda b, s: (b, 0, 0)),    # k == v
                pl.BlockSpec((1, 1, T), lambda b, s: (b, 0, 0)),     # key bias
            ],
            out_specs=pl.BlockSpec((1, ts, Dp), lambda b, s: (b, s, 0)),
        ),
        compiler_params=pltpu.CompilerParams(
            dimension_semantics=("parallel", "parallel"),
            vmem_limit_bytes=_VMEM_LIMIT_BYTES),
    )(q, enc_p, kbias)
    return ctx, Sp2


# -----------------------------------------------------------------------------
# Stage 2: vocab projection + online cross-entropy over flattened rows.
# grid = (row_tiles, vocab_tiles); each weight tile is reused across a full
# row tile, and the vocab axis is the trailing reduction axis for the LSE.
# -----------------------------------------------------------------------------
def proj_ce_kernel(ctx_ref, labels_ref, w_ref, b_ref, *rest, emit_logits):
    if emit_logits:
        logits_ref, nll_ref, m_scr, l_scr, picked_scr, iota_scr = rest
    else:
        nll_ref, m_scr, l_scr, picked_scr, iota_scr = rest

    j = pl.program_id(1)
    n_vt = pl.num_programs(1)
    tile_v = w_ref.shape[-1]

    @pl.when(j == 0)
    def _():
        m_scr[...] = jnp.full(m_scr.shape, -jnp.inf, jnp.float32)
        l_scr[...] = jnp.zeros(l_scr.shape, jnp.float32)
        picked_scr[...] = jnp.zeros(picked_scr.shape, jnp.float32)
        iota_scr[...] = lax.broadcasted_iota(jnp.int32, iota_scr.shape, 1)

    logits = lax.dot_general(ctx_ref[...], w_ref[...], (((1,), (0,)), ((), ())),
                             preferred_element_type=jnp.float32) + b_ref[...]
    if emit_logits:
        logits_ref[...] = logits.astype(logits_ref.dtype)

    # Label pick: compare cached lane iota against the tile-local label index
    # (one small subtract + one compare instead of per-tile iota + big add).
    labels = labels_ref[...]                                   # (tr, 1) int32
    onehot = iota_scr[...] == (labels - j * tile_v)            # (tr, tile_v)
    picked_scr[...] += jnp.sum(jnp.where(onehot, logits, 0.0),
                               axis=-1, keepdims=True)

    # Online log-sum-exp across vocab tiles (logits never re-read from HBM).
    m_old = m_scr[...]
    m_new = jnp.maximum(m_old, jnp.max(logits, axis=-1, keepdims=True))
    alpha = jnp.exp(m_old - m_new)
    l_scr[...] = l_scr[...] * alpha + jnp.sum(jnp.exp(logits - m_new),
                                              axis=-1, keepdims=True)
    m_scr[...] = m_new

    @pl.when(j == n_vt - 1)
    def _():
        valid = (labels_ref[...] != -100).astype(jnp.float32)
        nll_ref[...] = ((m_scr[...] + jnp.log(l_scr[...])) - picked_scr[...]) * valid


def vocab_proj_ce(prep, ctx2d, labels1d, *, row_tile_cap=256,
                  emit_logits=True, logits_dtype=jnp.bfloat16):
    N, Dp = ctx2d.shape
    V, Vp, tile_v = prep["V"], prep["Vp"], prep["tile_v"]
    tr = min(row_tile_cap, _round_up(N, 8))
    Np = _round_up(N, tr)
    if Np != N:
        ctx2d = jnp.pad(ctx2d, ((0, Np - N), (0, 0)))
        labels1d = jnp.pad(labels1d, ((0, Np - N),), constant_values=-100)
    labels2d = labels1d.reshape(Np, 1).astype(jnp.int32)
    n_rt, n_vt = Np // tr, Vp // tile_v

    nll_sds = jax.ShapeDtypeStruct((Np, 1), jnp.float32)
    nll_spec = pl.BlockSpec((tr, 1), lambda i, j: (i, 0))
    if emit_logits:
        out_shape = (jax.ShapeDtypeStruct((Np, Vp), logits_dtype), nll_sds)
        out_specs = (pl.BlockSpec((tr, tile_v), lambda i, j: (i, j)), nll_spec)
    else:
        out_shape = nll_sds
        out_specs = nll_spec

    outs = pl.pallas_call(
        functools.partial(proj_ce_kernel, emit_logits=emit_logits),
        out_shape=out_shape,
        grid_spec=pltpu.PrefetchScalarGridSpec(
            num_scalar_prefetch=0,
            grid=(n_rt, n_vt),
            in_specs=[
                pl.BlockSpec((tr, Dp), lambda i, j: (i, 0)),       # ctx (resident across j)
                pl.BlockSpec((tr, 1), lambda i, j: (i, 0)),        # labels
                pl.BlockSpec((Dp, tile_v), lambda i, j: (0, j)),   # weight tile
                pl.BlockSpec((1, tile_v), lambda i, j: (0, j)),    # bias tile
            ],
            out_specs=out_specs,
            scratch_shapes=[
                pltpu.VMEM((tr, 1), jnp.float32),      # running max
                pltpu.VMEM((tr, 1), jnp.float32),      # running sum-exp
                pltpu.VMEM((tr, 1), jnp.float32),      # logit at label
                pltpu.VMEM((1, tile_v), jnp.int32),    # lane iota (cached)
            ],
        ),
        compiler_params=pltpu.CompilerParams(
            dimension_semantics=("parallel", "arbitrary"),
            vmem_limit_bytes=_VMEM_LIMIT_BYTES),
    )(ctx2d, labels2d, prep["w"], prep["b"])

    if emit_logits:
        logits2d, nll2d = outs
    else:
        logits2d, nll2d = None, outs
    return logits2d, nll2d[:N, 0]


# -----------------------------------------------------------------------------
# HFWrapper forward (glue in plain JAX, heavy compute in the two kernels).
# -----------------------------------------------------------------------------
def hf_wrapper_forward(prep, input_ids, attention_mask,
                       decoder_attention_mask, encoder_outputs, labels=None,
                       *, return_logits=True, logits_dtype=jnp.bfloat16):
    B, S = input_ids.shape
    T = encoder_outputs.shape[1]
    # TODO(synk): query_mask (attention_mask) semantics depend on the wrapped
    # HF model; queries are left unmasked here (matches the reference model).
    key_mask = (jnp.ones((B, T), jnp.int32) if decoder_attention_mask is None
                else decoder_attention_mask)

    ctx, Sp2 = cross_attention(prep, input_ids, encoder_outputs, key_mask)
    ctx2d = ctx.reshape(B * Sp2, prep["Dp"])

    if labels is None:
        labels_k = jnp.full((B, Sp2), -100, jnp.int32)
    else:
        labels_k = jnp.pad(labels.astype(jnp.int32), ((0, 0), (0, Sp2 - S)),
                           constant_values=-100)
    labels1d = labels_k.reshape(B * Sp2)

    logits2d, nll = vocab_proj_ce(prep, ctx2d, labels1d,
                                  emit_logits=return_logits,
                                  logits_dtype=logits_dtype)
    retval = {}
    if return_logits:
        V, Vp = prep["V"], prep["Vp"]
        logits = logits2d[:B * Sp2].reshape(B, Sp2, Vp)[:, :S, :V]
        retval["logits"] = logits
    if labels is not None:
        count = jnp.sum((labels_k != -100).astype(jnp.float32))
        # Note: count==0 (all labels ignored) yields nan, matching PyTorch.
        retval["loss"] = jnp.sum(nll) / count
    return retval


# -----------------------------------------------------------------------------
# Pure-JAX reference (same bf16-in / f32-acc model definition) for sanity check.
# -----------------------------------------------------------------------------
def reference_forward(params, input_ids, attention_mask,
                      decoder_attention_mask, encoder_outputs, labels):
    D = params["embed"].shape[-1]
    scale = 1.0 / float(D) ** 0.5
    q = (jnp.take(params["embed"], input_ids, axis=0) * scale).astype(jnp.bfloat16)
    k = encoder_outputs.astype(jnp.bfloat16)
    scores = jnp.einsum("bsd,btd->bst", q, k, preferred_element_type=jnp.float32)
    kmask = decoder_attention_mask.astype(jnp.float32)[:, None, :]
    scores = jnp.where(kmask > 0.5, scores, -1e30)
    m = jnp.max(scores, axis=-1, keepdims=True)
    p = jnp.exp(scores - m)
    denom = jnp.sum(p, axis=-1, keepdims=True)
    ctx = jnp.einsum("bst,btd->bsd", p.astype(jnp.bfloat16), k,
                     preferred_element_type=jnp.float32) / denom
    logits = jnp.einsum("bsd,dv->bsv", ctx.astype(jnp.bfloat16),
                        params["w_vocab"].astype(jnp.bfloat16),
                        preferred_element_type=jnp.float32) + params["b_vocab"]
    V = logits.shape[-1]
    lp = jax.nn.log_softmax(logits.reshape(-1, V), axis=-1)
    lab = labels.reshape(-1)
    valid = lab != -100
    nll = -jnp.take_along_axis(lp, jnp.where(valid, lab, 0)[:, None], axis=-1)[:, 0]
    loss = jnp.sum(nll * valid) / jnp.sum(valid)
    return logits, loss


if __name__ == "__main__":
    B, S, T, D, V = 2, 8, 8, 32, 64
    V_in = 50  # input-id vocabulary for the embedding table

    key = jax.random.PRNGKey(0)
    k1, k2, k3, k4, k5, k6 = jax.random.split(key, 6)

    params = {
        "embed": jax.random.normal(k1, (V_in, D), jnp.float32) * 0.1,
        "w_vocab": jax.random.normal(k2, (D, V), jnp.float32) * 0.1,
        "b_vocab": jax.random.normal(k3, (V,), jnp.float32) * 0.01,
    }
    prep = prepare_params(params)   # padded/cast once, not per call

    input_ids = jax.random.randint(k4, (B, S), 0, V_in, jnp.int32)
    attention_mask = jnp.ones((B, S), jnp.int32)
    decoder_attention_mask = jnp.ones((B, T), jnp.int32).at[:, T - 2:].set(0)
    encoder_outputs = jax.random.normal(k5, (B, T, D), jnp.float32)
    labels = jax.random.randint(k6, (B, S), 0, V, jnp.int32)

    out = hf_wrapper_forward(prep, input_ids, attention_mask,
                             decoder_attention_mask, encoder_outputs, labels)
    jax.block_until_ready(out)

    # Loss-only mode (skips the logits HBM write entirely).
    out_loss_only = hf_wrapper_forward(prep, input_ids, attention_mask,
                                       decoder_attention_mask, encoder_outputs,
                                       labels, return_logits=False)
    jax.block_until_ready(out_loss_only)

    ref_logits, ref_loss = reference_forward(
        params, input_ids, attention_mask, decoder_attention_mask,
        encoder_outputs, labels)

    assert out["logits"].shape == (B, S, V)
    got_logits = out["logits"].astype(jnp.float32)
    assert jnp.allclose(got_logits, ref_logits, atol=3e-2, rtol=3e-2), (
        jnp.max(jnp.abs(got_logits - ref_logits)))
    assert jnp.allclose(out["loss"], ref_loss, atol=2e-2, rtol=2e-2), (
        out["loss"], ref_loss)
    assert jnp.allclose(out_loss_only["loss"], out["loss"], atol=1e-5, rtol=1e-5), (
        out_loss_only["loss"], out["loss"])

    print("KERNEL_OK")
</pallas_src>

<mosaic_0001>
module attributes {stable_mosaic.version = 11 : i64} {
  func.func @attn_kernel(%arg0: i32, %arg1: i32, %arg2: memref<1x8x128xbf16, #tpu.memory_space<vmem>>, %arg3: memref<1x8x128xbf16, #tpu.memory_space<vmem>>, %arg4: memref<1x1x8xf32, #tpu.memory_space<vmem>>, %arg5: memref<1x8x128xbf16, #tpu.memory_space<vmem>>) attributes {dimension_semantics = [#tpu.dimension_semantics<parallel>, #tpu.dimension_semantics<parallel>], iteration_bounds = array<i64: 2, 1>, scalar_prefetch = 0 : i64, scratch_operands = 0 : i64, tpu.core_type = #tpu.core_type<tc>, window_params = [{transform_indices = @transform_0, window_bounds = array<i64: 1, 8, 128>}, {transform_indices = @transform_1, window_bounds = array<i64: 1, 8, 128>}, {transform_indices = @transform_2, window_bounds = array<i64: 1, 1, 8>}, {transform_indices = @transform_3, window_bounds = array<i64: 1, 8, 128>}]} {
    %c0 = arith.constant 0 : index
    %c0_0 = arith.constant 0 : index
    %c0_1 = arith.constant 0 : index
    %0 = vector.load %arg2[%c0, %c0_0, %c0_1] : memref<1x8x128xbf16, #tpu.memory_space<vmem>>, vector<1x8x128xbf16>
    %1 = vector.shape_cast %0 : vector<1x8x128xbf16> to vector<8x128xbf16>
    %c0_2 = arith.constant 0 : index
    %c0_3 = arith.constant 0 : index
    %c0_4 = arith.constant 0 : index
    %2 = vector.load %arg3[%c0_2, %c0_3, %c0_4] : memref<1x8x128xbf16, #tpu.memory_space<vmem>>, vector<1x8x128xbf16>
    %3 = vector.shape_cast %2 : vector<1x8x128xbf16> to vector<8x128xbf16>
    %cst = arith.constant dense<0.000000e+00> : vector<8x8xf32>
    %4 = tpu.matmul %1, %3, %cst {dimension_numbers = #tpu.dot_dimension_numbers<[1], [1], [0], [0], [0, 0, 1, 0], [], []>} : vector<8x128xbf16>, vector<8x128xbf16>, vector<8x8xf32> -> vector<8x8xf32>
    %c0_5 = arith.constant 0 : index
    %c0_6 = arith.constant 0 : index
    %c0_7 = arith.constant 0 : index
    %5 = vector.load %arg4[%c0_5, %c0_6, %c0_7] : memref<1x1x8xf32, #tpu.memory_space<vmem>>, vector<1x1x8xf32>
    %6 = vector.shape_cast %5 : vector<1x1x8xf32> to vector<1x8xf32>
    %7 = vector.broadcast %6 : vector<1x8xf32> to vector<8x8xf32>
    %8 = arith.addf %4, %7 : vector<8x8xf32>
    %cst_8 = arith.constant dense<0xFF800000> : vector<8xf32>
    %9 = vector.multi_reduction <maximumf>, %8, %cst_8 [1] : vector<8x8xf32> to vector<8xf32>
    %10 = vector.shape_cast %9 : vector<8xf32> to vector<8x1xf32>
    %11 = vector.broadcast %10 : vector<8x1xf32> to vector<8x8xf32>
    %12 = arith.subf %8, %11 : vector<8x8xf32>
    %13 = math.exp %12 : vector<8x8xf32>
    %cst_9 = arith.constant dense<0.000000e+00> : vector<8xf32>
    %14 = vector.multi_reduction <add>, %13, %cst_9 [1] : vector<8x8xf32> to vector<8xf32>
    %15 = vector.shape_cast %14 : vector<8xf32> to vector<8x1xf32>
    %16 = arith.truncf %13 : vector<8x8xf32> to vector<8x8xbf16>
    %cst_10 = arith.constant dense<0.000000e+00> : vector<8x128xf32>
    %17 = tpu.matmul %16, %3, %cst_10 {dimension_numbers = #tpu.dot_dimension_numbers<[1], [0], [0], [1], [0, 0, 1, 1], [], []>} : vector<8x8xbf16>, vector<8x128xbf16>, vector<8x128xf32> -> vector<8x128xf32>
    %18 = tpu.reciprocal %15 {approx = true} : vector<8x1xf32> -> vector<8x1xf32>
    %19 = vector.broadcast %18 : vector<8x1xf32> to vector<8x128xf32>
    %20 = arith.mulf %17, %19 : vector<8x128xf32>
    %21 = arith.truncf %20 : vector<8x128xf32> to vector<8x128xbf16>
    %c0_11 = arith.constant 0 : index
    %c0_12 = arith.constant 0 : index
    %c0_13 = arith.constant 0 : index
    %22 = vector.load %arg5[%c0_11, %c0_12, %c0_13] : memref<1x8x128xbf16, #tpu.memory_space<vmem>>, vector<1x8x128xbf16>
    %23 = vector.shape_cast %22 : vector<1x8x128xbf16> to vector<8x128xbf16>
    %24 = vector.shape_cast %21 : vector<8x128xbf16> to vector<1x8x128xbf16>
    tpu.vector_store %arg5[%c0_11, %c0_12, %c0_13], %24 {strides = array<i32>} : memref<1x8x128xbf16, #tpu.memory_space<vmem>>, vector<1x8x128xbf16>,
    return
  }
  func.func @transform_0(%arg0: i32, %arg1: i32) -> (i32, i32, i32) {
    %c0_i32 = arith.constant 0 : i32
    %c0_i32_0 = arith.constant 0 : i32
    return %arg0, %arg1, %c0_i32 : i32, i32, i32
  }
  func.func @transform_1(%arg0: i32, %arg1: i32) -> (i32, i32, i32) {
    %c0_i32 = arith.constant 0 : i32
    %c0_i32_0 = arith.constant 0 : i32
    %c0_i32_1 = arith.constant 0 : i32
    return %arg0, %c0_i32, %c0_i32_0 : i32, i32, i32
  }
  func.func @transform_2(%arg0: i32, %arg1: i32) -> (i32, i32, i32) {
    %c0_i32 = arith.constant 0 : i32
    %c0_i32_0 = arith.constant 0 : i32
    %c0_i32_1 = arith.constant 0 : i32
    return %arg0, %c0_i32, %c0_i32_0 : i32, i32, i32
  }
  func.func @transform_3(%arg0: i32, %arg1: i32) -> (i32, i32, i32) {
    %c0_i32 = arith.constant 0 : i32
    %c0_i32_0 = arith.constant 0 : i32
    return %arg0, %arg1, %c0_i32 : i32, i32, i32
  }
}

</mosaic_0001>

<bundles_post_ra>
// kernel: tpu_custom_call.1
= control target key start
LH: loop header
LB: loop body
LE: loop exit
PB: predicated region body
PF: predicated region fallthrough
CT: control target
= control target key end

     0   :  { %8 = vsyncpa [#allocation3], 0  ;;  %s1006_s0 = inlined_call_operand.hbm [shape: bf16[2,8,128], index: 0, kind: input, shape index: {}]   ;;  %s1007_s1 = inlined_call_operand.hbm [shape: bf16[2,8,128], index: 1, kind: input, shape index: {}]   ;;  %s1008_s2 = inlined_call_operand.vmem [shape: f32[2,1,8], index: 2, kind: input, shape index: {}]   ;;  %s1009_s3 = inlined_call_operand.hbm [shape: bf16[2,8,128], index: 3, kind: output, shape index: {}]  }
   0x1   :  { %10 = vsyncpa [#allocation3 + $0x1], 0 }
   0x2   :  { %11 = vsyncpa [#allocation6], 0 }
   0x3   :  { %13 = vsyncpa [#allocation6 + $0x1], 0 }
   0x4   :  { %14 = vsyncpa [#allocation4], 0 }
   0x5   :  { %16 = vsyncpa [#allocation4 + $0x1], 0  ;;  %s773_s12 = smov 0   ;;  %s775_s13 = smov 0  }
   0x6   :  { %s777_s14 = smov 0   ;;  %s779_s15 = smov 0  }
   0x7   :  { %s781_s16 = smov 0   ;;  %s783_s17 = smov 0  }
   0x8 LB: > { %s493_s18 = sadd.s32 4294967295, %s746_s17   ;;  %s494_s19 = sadd.s32 4294967294, %s746_s17   ;;  %s746_s17 = sphi %s783_s17, %s22_s17   ;;  %s742_s16 = sphi %s781_s16, %s1029_s16   ;;  %s738_s15 = sphi %s779_s15, %s1028_s15   ;;  %s734_s14 = sphi %s777_s14, %s1027_s14   ;;  %s730_s13 = sphi %s775_s13, %s1026_s13   ;;  %s726_s12 = sphi %s773_s12, %s1025_s12  }
   0x9   : > { %s34_s20 = sadd.s32 1, %s742_s16  ;;  %s43_s21 = sadd.s32 1, %s734_s14 }
   0xa   : > { %p36_p0 = scmp.ge.s32.totalorder %s34_s20, 2  ;;  %p50_p1 = scmp.ne.s32.totalorder %s734_s14, %s730_s13 }
   0xb   : > { %p51_p2 = scmp.eq.s32.totalorder %s746_s17, 0  ;;  %p56_p3 = scmp.ne.s32.totalorder %s730_s13, %s726_s12 }
   0xc   : > { %s1031_s20 = smov (%p36_p0, %s34_s20), 0  ;;  %p57_p5 = scmp.eq.s32.totalorder %s493_s18, 0 }
   0xd   : > { %p814_p4 = por %p51_p2, %p50_p1  ;;  %s38_s23 = ssub.s32 %s742_s16, %s1031_s20 }
   0xe   : > { %p134_p6 = scmp.eq.s32.totalorder %s493_s18, 1  ;;  %p41_p7 = scmp.eq.s32.totalorder %s38_s23, 0 }
   0xf   : > { %p820_p8 = por %p57_p5, %p56_p3  ;;  %p140_p10 = scmp.eq.s32.totalorder %s494_s19, 1 }
  0x10   : > { %p824_p9 = por %p134_p6, %p50_p1  ;;  %p544_p13 = scmp.lt.s32.totalorder %s746_s17, 2 }
  0x11   : > { %s1013_s24 = scalar_select %p820_p8, 1, 0 }
  0x12   : > { %s1014_s25 = scalar_select %p824_p9, 1, 0 }
  0x13   : > { %s829_s26 = scalar_select %p41_p7, %s734_s14, %s43_s21  }
  0x14   : > { %p831_p11 = por %p140_p10, %p56_p3  ;;  %s838_s28 = sand.u32 1, %s734_s14  }
  0x15   : > { %s497_s29 = sshll.u32 %s838_s28, 2  ;;  %s498_s30 = sshll.u32 %s742_s16, 6 }
  0x16   : > { %s1015_s27 = scalar_select %p831_p11, 1, 0 }
  0x17   : > { %s847_s6 = scalar_lea.hbm %s1006_s0, %s498_s30  ;;  %s164_s7 = scalar_lea.vmem [#allocation2], %s497_s29 }
  0x18   : > { %s172_s8 = sshll.u32 %s164_s7, 4  ;;  %p855_p0 = pnand %p544_p13, %p814_p4  ;;  %s851_s8 = int_to_ptr.vmem [resolvable:$true] %s172_s8 }
  0x19   : > { %s161_s10 = scalar_lea.sflag [#allocation3], %s838_s28  ;;  %s600_s11 = scalar_lea.hbm %s847_s6, 64 }
  0x1a   : > { %p601_p3 = scmp.ne.s32.totalorder %s847_s6, %s600_s11  ;;  %p602_p5 = pneg %p855_p0 }
  0x1b   : > { %s605_s21 = scalar_lea.hbm %s1006_s0, 128  ;;  %p606_p4 = scmp.lt.u32.totalorder %s847_s6, %s1006_s0 }
  0x1c   : > { %p603_p6 = pnand %p602_p5, %p601_p3  ;;  %p607_p10 = scmp.lt.u32.totalorder %s605_s21, %s600_s11 }
  0x1d   : > { %p609_p12 = scmp.lt.u32.totalorder %s600_s11, %s847_s6 }
  0x1e   : > { %p604_p7 = pneg %p603_p6  ;;  %p608_p13 = por %p607_p10, %p606_p4 }
  0x20   : > { %p610_p1 = por %p609_p12, %p608_p13 }
  0x22   : > { %p611_p2 = pnand %p610_p1, %p604_p7 }
  0x24   : > { %614 = shalt.err (!%p611_p2)
}
  0x25   : > { %s615_s4 = scalar_lea.vmem %s851_s8, 64  ;;  %s748_s5 = smov [#allocation2]  }
  0x26   : > { %p616_p3 = scmp.ne.s32.totalorder %s851_s8, %s615_s4  ;;  %s620_s7 = sshll.u32 %s748_s5, 4  ;;  %s621_s7 = int_to_ptr.vmem [resolvable:$false] %s620_s7 }
  0x27   : > { %s622_s18 = scalar_lea.vmem %s621_s7, 128  ;;  %p623_p9 = scmp.lt.s32.totalorder %s851_s8, %s621_s7 }
  0x28   : > { %p618_p6 = pnand %p616_p3, %p602_p5  ;;  %p624_p4 = scmp.lt.s32.totalorder %s622_s18, %s615_s4 }
  0x2a   : > { %p619_p11 = pneg %p618_p6  ;;  %p625_p10 = por %p624_p4, %p623_p9 }
  0x2c   : > { %p626_p12 = pnand %p625_p10, %p619_p11 }
  0x2e   : > { %629 = shalt.err (!%p626_p12)
}
  0x2f   : > { %536 = dma.hbm_to_vmem [thread:$0]  (!%p855_p0), %s847_s6, 64, %s851_s8, %s161_s10  }
  0x30   : > { %p1017_p1 = scmp.lt.s32.totalorder %s746_s17, 3  ;;  %p1018_p2 = scmp.ge.s32.totalorder %s746_s17, 1 }
  0x31   : > { %s900_s22 = scalar_lea.hbm %s1007_s1, %s498_s30  ;;  %s183_s23 = scalar_lea.vmem [#allocation5], %s497_s29 }
  0x32   : > { %p891_p7 = pnand %p1018_p2, %p1017_p1  ;;  %s190_s4 = sshll.u32 %s183_s23, 4  ;;  %s191_s4 = int_to_ptr.vmem [resolvable:$true] %s190_s4 }
  0x33   : > { %s180_s6 = scalar_lea.sflag [#allocation6], %s838_s28  ;;  %s630_s8 = scalar_lea.hbm %s900_s22, 64 }
  0x34   : > { %s1019_s11 = scalar_select %p891_p7, 1, 0 }
  0x35   : > { %p631_p9 = scmp.ne.s32.totalorder %s900_s22, %s630_s8  ;;  %s635_s30 = scalar_lea.hbm %s1007_s1, 128 }
  0x36   : > { %p636_p3 = scmp.lt.u32.totalorder %s900_s22, %s1007_s1  ;;  %p637_p6 = scmp.lt.u32.totalorder %s635_s30, %s630_s8 }
  0x37   : > { %p633_p11 = pnand %p631_p9, %p602_p5  ;;  %p639_p10 = scmp.lt.u32.totalorder %s630_s8, %s900_s22 }
  0x38   : > { %p638_p4 = por %p637_p6, %p636_p3 }
  0x39   : > { %p634_p13 = pneg %p633_p11 }
  0x3a   : > { %p640_p12 = por %p639_p10, %p638_p4 }
  0x3c   : > { %p641_p1 = pnand %p640_p12, %p634_p13 }
  0x3e   : > { %644 = shalt.err (!%p641_p1)
}
  0x3f   : > { %s645_s28 = scalar_lea.vmem %s191_s4, 64  ;;  %s749_s29 = smov [#allocation5]  }
  0x40   : > { %p646_p2 = scmp.ne.s32.totalorder %s191_s4, %s645_s28  ;;  %s650_s19 = sshll.u32 %s749_s29, 4  ;;  %s651_s19 = int_to_ptr.vmem [resolvable:$false] %s650_s19 }
  0x41   : > { %s652_s21 = scalar_lea.vmem %s651_s19, 128  ;;  %p653_p8 = scmp.lt.s32.totalorder %s191_s4, %s651_s19 }
  0x42   : > { %p648_p9 = pnand %p646_p2, %p602_p5  ;;  %p654_p7 = scmp.lt.s32.totalorder %s652_s21, %s645_s28 }
  0x44   : > { %p649_p11 = pneg %p648_p9  ;;  %p655_p3 = por %p654_p7, %p653_p8 }
  0x46   : > { %p656_p6 = pnand %p655_p3, %p649_p11 }
  0x48   : > { %659 = shalt.err (!%p656_p6)
}
  0x49   : > { %539 = dma.hbm_to_vmem [thread:$0]  (!%p855_p0), %s900_s22, 64, %s191_s4, %s180_s6  }
  0x4a   : > { %p1020_p13 = scmp.ne.s32.totalorder %s1019_s11, 0 }
  0x4b   : > { %s927_s23 = sand.u32 (!%p1020_p13), 1, %s730_s13   ;;  %p1021_p8 = scmp.ne.s32.totalorder (!%p1020_p13), %s1013_s24, 0 }
  0x4c   : > { %205 = sbr.rel (%p1020_p13) target bundleno = 700 (0x2bc), region = 32  ;;  %s930_s8 = sshll.u32 (!%p1020_p13), %s927_s23, 2 }
  0x4d   : > { %s208_s10 = scalar_lea.sflag (!%p1020_p13), [#allocation3], %s927_s23  ;;  %s211_s5 = scalar_lea.vmem (!%p1020_p13), [#allocation2], %s930_s8 }
  0x53   : > { %713 = dma.done.wait (%p1021_p8), %s208_s10, 64  }
  0x54   : > { %715 = vsyncadd (%p1021_p8), %s208_s10, 4294967232  ;;  %s217_s9 = scalar_lea.sflag [#allocation6], %s927_s23  ;;  %s220_s11 = scalar_lea.vmem [#allocation5], %s930_s8 }
  0x55   : > { %717 = dma.done.wait (%p1021_p8), %s217_s9, 64  }
  0x56   : > { %719 = vsyncadd (%p1021_p8), %s217_s9, 4294967232  ;;  %v750_v0 = vmov 0.0   ;;  %vm751_vm0 = vmmov 0   ;;  %v256_v1 = vld [vmem:[%s220_s11] sm:$0xf]  ;;  %p251_p0 = scmp.lt.s32.totalorder %s738_s15, 1 }
  0x57   : > { %515 = vmatprep.subr.bf16.mxu0 %v750_v0  ;;  %517 = vmatprep.mubr.msk.bf16.mxu0 %vm751_vm0, %v750_v0  ;;  %v255_v2 = vld [vmem:[%s211_s5] sm:$0xf]  ;;  %vm304_vm1 = vcmask 64512   ;;  %vm318_vm2 = vcmask 1043456   ;;  %s508_s24 = sshll.u32 %s738_s15, 6  ;;  %s250_s7 = scalar_lea.vmem [#allocation7], %s930_s8 }
  0x58   : > { %521 = vmatprep.subr.bf16.mxu1 %v750_v0  ;;  %523 = vmatprep.mubr.msk.bf16.mxu1 %vm751_vm0, %v750_v0  ;;  %s252_s22 = scalar_select %p251_p0, %s738_s15, 1  ;;  %v320_v10 = vsel %vm318_vm2, %v256_v1, 0 }
  0x59   : > { %516 = vmatpush3.bf16.xpose.msra.mxu0 %v256_v1  ;;  %522 = vmatpush3.bf16.msra.mxu1 %v320_v10  ;;  %s381_s18 = sshll.u32 %s250_s7, 4  ;;  %s957_s19 = scalar_lea.hbm %s1009_s3, %s508_s24  ;;  %s959_s18 = int_to_ptr.vmem [resolvable:$true] %s381_s18 }
  0x5a   : > { %s253_s30 = scalar_lea.vmem %s1008_s2, %s252_s22  ;;  %s367_s21 = scalar_lea.sflag [#allocation4], %s927_s23 }
  0x5b   : > { %v505_v3 = vld [vmem:[%s253_s30] ss:$0 sm:$0xff]  ;;  %s660_s15 = scalar_lea.vmem %s959_s18, 64  ;;  %p1022_p7 = scmp.ne.s32.totalorder %s1014_s25, 0 }
  0x5c   : > { %p661_p5 = scmp.ne.s32.totalorder %s959_s18, %s660_s15  ;;  %s752_s8 = smov [#allocation7]  }
  0x5d   : > { %s664_s10 = sshll.u32 %s752_s8, 4  ;;  %s665_s10 = int_to_ptr.vmem [resolvable:$false] %s664_s10 }
  0x5e   : > { %p662_p4 = pnand %p661_p5, %p1022_p7  ;;  %s666_s5 = scalar_lea.vmem %s665_s10, 128 }
  0x5f   : > { %p667_p12 = scmp.lt.s32.totalorder %s959_s18, %s665_s10  ;;  %p668_p1 = scmp.lt.s32.totalorder %s666_s5, %s660_s15 }
  0x60   : > { %518 = vmatmul.mubr.bf16.vlgmr.msra.gmra.mrb[0].mxu0 %v255_v2  ;;  %p663_p10 = pneg %p662_p4 }
  0x61   : > { %p669_p2 = por %p668_p1, %p667_p12 }
  0x63   : > { %p670_p9 = pnand %p669_p2, %p663_p10 }
 0x133   : > { %v298_v4 = vpop.f32.mrb[0].mxu0 }
 0x134   : > { %v299_v5 = vadd.f32 %v505_v3, %v298_v4  ;;  %v519_v6 = vpop.f32.mrb[1].mxu0 }
 0x135   : > { %v301_v7 = vpop.f32.mrb[2].mxu0 }
 0x136   : > { %v520_v8 = vpop.f32.mrb[3].mxu0  ;;  %v305_v9 = vsel %vm304_vm1, %v299_v5, -inf }
 0x137   : > { %306 = vmax.xlane.f32.xlu0 %v305_v9 }
 0x1c4   : > { %v307_v11 = vpop.xlane.xlu0 %306 }
 0x1c5   : > { %v308_v12 = vsub.f32 %v299_v5, %v307_v11 }
 0x1c7   : > { %v309_v13 = vmul.f32 1.442695, %v308_v12 }
 0x1c9   : > { %596 = vpow2.f32 %v309_v13 }
 0x1d3   : > { %v597_v14 = vpop.eup %596 }
 0x1d4   : > { %v311_v15 = vsel %vm304_vm1, %v597_v14, 0.0  ;;  %v314_v16 = vpack.c.bf16 %v597_v14, %v597_v14 }
 0x1d5   : > { %312 = vadd.xlane.f32.xlu0 %v311_v15 }
 0x1d6   : > { %524 = vmatmul.mubr.msk.bf16.vlgmr.msra.gmra.mrb[0].mxu1 %vm304_vm1, %v314_v16 }
 0x262   : > { %v313_v17 = vpop.xlane.xlu0 %312 }
 0x263   : > { %598 = vrcp.f32 %v313_v17 }
 0x26d   : > { %v599_v18 = vpop.eup %598 }
 0x2a9   : > { %v356_v19 = vpop.f32.mrb[0].mxu1 }
 0x2aa   : > { %v363_v20 = vmul.f32 %v599_v18, %v356_v19  ;;  %v525_v21 = vpop.f32.mrb[1].mxu1 }
 0x2ab   : > { %v359_v22 = vpop.f32.mrb[2].mxu1 }
 0x2ac   : > { %v364_v23 = vpack.c.bf16 %v363_v20, %v363_v20  ;;  %v526_v24 = vpop.f32.mrb[3].mxu1 }
 0x2ae   : > { %365 = vst [vmem:[%s250_s7] sm:$0xf] %v364_v23 }
 0x2af   : > { %673 = shalt.err (!%p670_p9)
}
 0x2b0   : > { %s674_s23 = scalar_lea.hbm %s957_s19, 64  ;;  %s678_s22 = scalar_lea.hbm %s1009_s3, 128 }
 0x2b1   : > { %p675_p11 = scmp.ne.s32.totalorder %s957_s19, %s674_s23  ;;  %p679_p13 = scmp.lt.u32.totalorder %s957_s19, %s1009_s3 }
 0x2b2   : > { %p680_p8 = scmp.lt.u32.totalorder %s678_s22, %s674_s23  ;;  %p682_p5 = scmp.lt.u32.totalorder %s674_s23, %s957_s19 }
 0x2b3   : > { %p676_p3 = pnand %p675_p11, %p1022_p7 }
 0x2b4   : > { %p681_p0 = por %p680_p8, %p679_p13 }
 0x2b5   : > { %p677_p6 = pneg %p676_p3 }
 0x2b6   : > { %p683_p4 = por %p682_p5, %p681_p0 }
 0x2b8   : > { %p684_p10 = pnand %p683_p4, %p677_p6 }
 0x2ba   : > { %687 = shalt.err (!%p684_p10)
}
 0x2bb   : > { %531 = dma.vmem_to_hbm [thread:$0]  (%p1022_p7), %s959_s18, 64, %s957_s19, %s367_s21  }
 0x2bc PF: > { %s393_s30 = sand.u32 1, %s726_s12   ;;  %p1023_p12 = scmp.ne.s32.totalorder %s1015_s27, 0 }
 0x2bd   : > { %p1024_p1 = scmp.ge.s32.totalorder %s746_s17, 2  ;;  %s394_s24 = scalar_lea.sflag [#allocation4], %s393_s30 }
 0x2bf   : > { %p541_p2 = pnand %p1024_p1, %p1023_p12 }
 0x2c1   : > { %721 = dma.done.wait (!%p541_p2), %s394_s24, 64  }
 0x2c2   : > { %723 = vsyncadd (!%p541_p2), %s394_s24, 4294967232  ;;  %s22_s17 = sadd.s32 1, %s746_s17   ;;  %s1025_s12 = smov %s730_s13 }
 0x2c3   : > { %p19_p9 = scmp.ge.s32.totalorder %s22_s17, 4   ;;  %s1026_s13 = smov %s734_s14 }
 0x2c4   : > { %s1027_s14 = smov %s829_s26  ;;  %s1028_s15 = smov %s742_s16 }
 0x2c5   : > { %s1029_s16 = smov %s1031_s20  ;;  %21 = sbr.rel (!%p19_p9) target bundleno = 8 (0x8), region = 93 }
 0x2cc   :  { %399 = vsyncpa [#allocation3], 1 }
 0x2cd   :  { %401 = vsyncpa [#allocation3 + $0x1], 1 }
 0x2ce   :  { %402 = vsyncpa [#allocation6], 1 }
 0x2cf   :  { %404 = vsyncpa [#allocation6 + $0x1], 1 }
 0x2d0   :  { %405 = vsyncpa [#allocation4], 1 }
 0x2d1   :  { %407 = vsyncpa [#allocation4 + $0x1], 1 }

</bundles_post_ra>
